<compile_context>
chip_gen: v5e
topology: v5e:2x2
jax: 0.10.0
libtpu: 0.0.40
codegen_flags: <defaults>
</compile_context>

<pallas_src>
import functools

import jax
import jax.numpy as jnp
from jax.experimental import pallas as pl
from jax.experimental.pallas import tpu as pltpu

_LANES = 128


def _dice_partial_kernel(x_ref, t_ref, inter_ref, insum_ref, tgtsum_ref, *,
                         rows_tile, r_total, steps, needs_mask):
    k = pl.program_id(1)

    @pl.when(k == 0)
    def _():
        inter_ref[...] = jnp.zeros_like(inter_ref)
        insum_ref[...] = jnp.zeros_like(insum_ref)
        tgtsum_ref[...] = jnp.zeros_like(tgtsum_ref)

    x = x_ref[...].astype(jnp.float32)   # (N, rows_tile, 128)
    t = t_ref[...].astype(jnp.float32)

    if needs_mask:
        # Global (unclamped) row-block id: blocks past the end of the data
        # (duplicated reads from the clamped index_map) get valid <= 0 and
        # are fully masked; the last real block gets a partial row mask.
        s = pl.program_id(0)
        g = s * steps + k
        valid = r_total - g * rows_tile
        row_id = jax.lax.broadcasted_iota(jnp.int32, x.shape, dimension=1)
        m = row_id < valid
        x = jnp.where(m, x, 0.0)
        t = jnp.where(m, t, 0.0)

    inter_ref[...] += jnp.sum(x * t, axis=1)   # (N, 128)
    insum_ref[...] += jnp.sum(x, axis=1)       # (N, 128)
    tgtsum_ref[...] += jnp.sum(t, axis=1)      # (N, 128)


def binary_dice_loss(inputs, targets, *, num_shards=2, rows_tile=None,
                     vmem_budget_bytes=10 * 1024 * 1024):
    """Pallas TPU implementation of BinaryDiceLoss.forward (scalar f32)."""
    n = targets.shape[0]
    x = inputs.reshape(n, -1)
    t = targets.reshape(n, -1)
    d = x.shape[1]

    # Lane-pack the reduction axis: (N, D) -> (N, R, 128).  Contiguous, so
    # the reshape is free when D is a multiple of 128 (the common case).
    if d % _LANES != 0:
        # TODO(synk): odd D needs a real zero-pad (one extra HBM copy);
        # zeros do not change any of the sums, so results stay exact.
        pad = _LANES - d % _LANES
        x = jnp.pad(x, ((0, 0), (0, pad)))
        t = jnp.pad(t, ((0, 0), (0, pad)))
    r = x.shape[1] // _LANES
    x = x.reshape(n, r, _LANES)
    t = t.reshape(n, r, _LANES)

    itemsize = max(x.dtype.itemsize, t.dtype.itemsize)
    if rows_tile is None:
        # 2 inputs x 2 pipeline buffers of (N, rows_tile, 128) each.
        per_row = 2 * 2 * n * _LANES * itemsize
        budget_rows = max(8, (vmem_budget_bytes // per_row) // 8 * 8)
        rows_tile = r if r <= budget_rows else budget_rows
    rows_tile = int(rows_tile)

    total_row_blocks = pl.cdiv(r, rows_tile)
    num_shards = max(1, min(int(num_shards), total_row_blocks))
    steps = pl.cdiv(total_row_blocks, num_shards)
    needs_mask = (r % rows_tile != 0) or (num_shards * steps != total_row_blocks)

    def in_map(s, k):
        g = s * steps + k
        if needs_mask:
            # Clamp duplicated trailing blocks in-bounds; they are fully
            # masked inside the kernel so they contribute nothing.
            g = jnp.minimum(g, total_row_blocks - 1)
        return (0, g, 0)

    in_spec = pl.BlockSpec((n, rows_tile, _LANES), in_map)
    out_spec = pl.BlockSpec((None, n, _LANES), lambda s, k: (s, 0, 0))
    out_shape = jax.ShapeDtypeStruct((num_shards, n, _LANES), jnp.float32)

    kernel = functools.partial(
        _dice_partial_kernel, rows_tile=rows_tile, r_total=r, steps=steps,
        needs_mask=needs_mask)

    cost = pl.CostEstimate(
        flops=4 * n * r * _LANES,
        transcendentals=0,
        bytes_accessed=2 * n * r * _LANES * itemsize)

    inter_p, in_p, tgt_p = pl.pallas_call(
        kernel,
        out_shape=(out_shape, out_shape, out_shape),
        grid_spec=pltpu.PrefetchScalarGridSpec(
            num_scalar_prefetch=0,
            grid=(num_shards, steps),
            in_specs=[in_spec, in_spec],
            out_specs=(out_spec, out_spec, out_spec),
        ),
        compiler_params=pltpu.CompilerParams(
            dimension_semantics=("parallel", "arbitrary")),
        cost_estimate=cost,
    )(x, t)

    # Tiny epilogue in plain JAX: fold shards + lanes, then dice.
    smooth = jnp.float32(1.0)
    intersection = inter_p.sum(axis=(0, 2))   # (N,)
    input_sum = in_p.sum(axis=(0, 2))         # (N,)
    target_sum = tgt_p.sum(axis=(0, 2))       # (N,)
    dice = (2.0 * intersection + smooth) / (input_sum + target_sum + smooth)
    return jnp.float32(1.0) - dice.sum() / jnp.float32(n)


def _reference_dice_loss(inputs, targets):
    n = targets.shape[0]
    smooth = 1.0
    x = inputs.reshape(n, -1).astype(jnp.float32)
    t = targets.reshape(n, -1).astype(jnp.float32)
    inter = (x * t).sum(axis=1)
    dice = (2.0 * inter + smooth) / (x.sum(axis=1) + t.sum(axis=1) + smooth)
    return 1.0 - dice.sum() / n


if __name__ == "__main__":
    key = jax.random.PRNGKey(0)
    k1, k2, k3, k4 = jax.random.split(key, 4)

    # Main case: N=2, C=4, 16x16 (D = 1024, lane-packs for free).
    x = jax.nn.sigmoid(jax.random.normal(k1, (2, 4, 16, 16), dtype=jnp.float32))
    t = (jax.random.uniform(k2, (2, 4, 16, 16)) > 0.5).astype(jnp.float32)
    loss = jax.block_until_ready(binary_dice_loss(x, t))
    ref = _reference_dice_loss(x, t)
    assert jnp.allclose(loss, ref, atol=1e-5, rtol=1e-5), (loss, ref)

    # Exercise the masked + multi-shard ("parallel" grid axis) path:
    # D = 4*24*24 = 2304 -> R = 18 rows, forced rows_tile=8, 2 shards.
    x2 = jax.nn.sigmoid(jax.random.normal(k3, (2, 4, 24, 24), dtype=jnp.float32))
    t2 = (jax.random.uniform(k4, (2, 4, 24, 24)) > 0.5).astype(jnp.float32)
    loss2 = jax.block_until_ready(
        binary_dice_loss(x2, t2, rows_tile=8, num_shards=2))
    ref2 = _reference_dice_loss(x2, t2)
    assert jnp.allclose(loss2, ref2, atol=1e-5, rtol=1e-5), (loss2, ref2)

    print("KERNEL_OK")
</pallas_src>

<mosaic_0001>
module attributes {stable_mosaic.version = 11 : i64} {
  func.func @_dice_partial_kernel(%arg0: i32, %arg1: i32, %arg2: memref<2x8x128xf32, #tpu.memory_space<vmem>>, %arg3: memref<2x8x128xf32, #tpu.memory_space<vmem>>, %arg4: memref<1x2x128xf32, #tpu.memory_space<vmem>>, %arg5: memref<1x2x128xf32, #tpu.memory_space<vmem>>, %arg6: memref<1x2x128xf32, #tpu.memory_space<vmem>>) attributes {dimension_semantics = [#tpu.dimension_semantics<parallel>, #tpu.dimension_semantics<arbitrary>], iteration_bounds = array<i64: 1, 1>, scalar_prefetch = 0 : i64, scratch_operands = 0 : i64, tpu.core_type = #tpu.core_type<tc>, window_params = [{transform_indices = @transform_0, window_bounds = array<i64: 2, 8, 128>}, {transform_indices = @transform_1, window_bounds = array<i64: 2, 8, 128>}, {transform_indices = @transform_2, window_bounds = array<i64: 1, 2, 128>}, {transform_indices = @transform_3, window_bounds = array<i64: 1, 2, 128>}, {transform_indices = @transform_4, window_bounds = array<i64: 1, 2, 128>}]} {
    %c0_i32 = arith.constant 0 : i32
    %0 = arith.cmpi eq, %arg1, %c0_i32 : i32
    %1 = arith.extui %0 : i1 to i32
    %c0_i32_0 = arith.constant 0 : i32
    %2 = arith.cmpi ne, %1, %c0_i32_0 : i32
    scf.if %2 {
      %cst_26 = arith.constant 0.000000e+00 : f32
      %27 = vector.broadcast %cst_26 : f32 to vector<2x128xf32>
      %c0_27 = arith.constant 0 : index
      %c0_28 = arith.constant 0 : index
      %c0_29 = arith.constant 0 : index
      %28 = vector.load %arg4[%c0_27, %c0_28, %c0_29] : memref<1x2x128xf32, #tpu.memory_space<vmem>>, vector<1x2x128xf32>
      %29 = vector.shape_cast %28 : vector<1x2x128xf32> to vector<2x128xf32>
      %30 = vector.shape_cast %27 : vector<2x128xf32> to vector<1x2x128xf32>
      tpu.vector_store %arg4[%c0_27, %c0_28, %c0_29], %30 {strides = array<i32>} : memref<1x2x128xf32, #tpu.memory_space<vmem>>, vector<1x2x128xf32>,
      %cst_30 = arith.constant 0.000000e+00 : f32
      %31 = vector.broadcast %cst_30 : f32 to vector<2x128xf32>
      %c0_31 = arith.constant 0 : index
      %c0_32 = arith.constant 0 : index
      %c0_33 = arith.constant 0 : index
      %32 = vector.load %arg5[%c0_31, %c0_32, %c0_33] : memref<1x2x128xf32, #tpu.memory_space<vmem>>, vector<1x2x128xf32>
      %33 = vector.shape_cast %32 : vector<1x2x128xf32> to vector<2x128xf32>
      %34 = vector.shape_cast %31 : vector<2x128xf32> to vector<1x2x128xf32>
      tpu.vector_store %arg5[%c0_31, %c0_32, %c0_33], %34 {strides = array<i32>} : memref<1x2x128xf32, #tpu.memory_space<vmem>>, vector<1x2x128xf32>,
      %cst_34 = arith.constant 0.000000e+00 : f32
      %35 = vector.broadcast %cst_34 : f32 to vector<2x128xf32>
      %c0_35 = arith.constant 0 : index
      %c0_36 = arith.constant 0 : index
      %c0_37 = arith.constant 0 : index
      %36 = vector.load %arg6[%c0_35, %c0_36, %c0_37] : memref<1x2x128xf32, #tpu.memory_space<vmem>>, vector<1x2x128xf32>
      %37 = vector.shape_cast %36 : vector<1x2x128xf32> to vector<2x128xf32>
      %38 = vector.shape_cast %35 : vector<2x128xf32> to vector<1x2x128xf32>
      tpu.vector_store %arg6[%c0_35, %c0_36, %c0_37], %38 {strides = array<i32>} : memref<1x2x128xf32, #tpu.memory_space<vmem>>, vector<1x2x128xf32>,
    } else {
    }
    %c0 = arith.constant 0 : index
    %c0_1 = arith.constant 0 : index
    %c0_2 = arith.constant 0 : index
    %3 = vector.load %arg2[%c0, %c0_1, %c0_2] : memref<2x8x128xf32, #tpu.memory_space<vmem>>, vector<2x8x128xf32>
    %c0_3 = arith.constant 0 : index
    %c0_4 = arith.constant 0 : index
    %c0_5 = arith.constant 0 : index
    %4 = vector.load %arg3[%c0_3, %c0_4, %c0_5] : memref<2x8x128xf32, #tpu.memory_space<vmem>>, vector<2x8x128xf32>
    %c0_6 = arith.constant 0 : index
    %c0_7 = arith.constant 0 : index
    %c0_8 = arith.constant 0 : index
    %5 = vector.load %arg4[%c0_6, %c0_7, %c0_8] : memref<1x2x128xf32, #tpu.memory_space<vmem>>, vector<1x2x128xf32>
    %6 = vector.shape_cast %5 : vector<1x2x128xf32> to vector<2x128xf32>
    %7 = arith.mulf %3, %4 : vector<2x8x128xf32>
    %cst = arith.constant dense<0.000000e+00> : vector<2x128xf32>
    %8 = vector.multi_reduction <add>, %7, %cst [1] : vector<2x8x128xf32> to vector<2x128xf32>
    %9 = arith.addf %6, %8 : vector<2x128xf32>
    %c0_9 = arith.constant 0 : index
    %c0_10 = arith.constant 0 : index
    %c0_11 = arith.constant 0 : index
    %10 = vector.load %arg4[%c0_9, %c0_10, %c0_11] : memref<1x2x128xf32, #tpu.memory_space<vmem>>, vector<1x2x128xf32>
    %11 = vector.shape_cast %10 : vector<1x2x128xf32> to vector<2x128xf32>
    %12 = vector.shape_cast %9 : vector<2x128xf32> to vector<1x2x128xf32>
    tpu.vector_store %arg4[%c0_9, %c0_10, %c0_11], %12 {strides = array<i32>} : memref<1x2x128xf32, #tpu.memory_space<vmem>>, vector<1x2x128xf32>,
    %c0_12 = arith.constant 0 : index
    %c0_13 = arith.constant 0 : index
    %c0_14 = arith.constant 0 : index
    %13 = vector.load %arg5[%c0_12, %c0_13, %c0_14] : memref<1x2x128xf32, #tpu.memory_space<vmem>>, vector<1x2x128xf32>
    %14 = vector.shape_cast %13 : vector<1x2x128xf32> to vector<2x128xf32>
    %cst_15 = arith.constant dense<0.000000e+00> : vector<2x128xf32>
    %15 = vector.multi_reduction <add>, %3, %cst_15 [1] : vector<2x8x128xf32> to vector<2x128xf32>
    %16 = arith.addf %14, %15 : vector<2x128xf32>
    %c0_16 = arith.constant 0 : index
    %c0_17 = arith.constant 0 : index
    %c0_18 = arith.constant 0 : index
    %17 = vector.load %arg5[%c0_16, %c0_17, %c0_18] : memref<1x2x128xf32, #tpu.memory_space<vmem>>, vector<1x2x128xf32>
    %18 = vector.shape_cast %17 : vector<1x2x128xf32> to vector<2x128xf32>
    %19 = vector.shape_cast %16 : vector<2x128xf32> to vector<1x2x128xf32>
    tpu.vector_store %arg5[%c0_16, %c0_17, %c0_18], %19 {strides = array<i32>} : memref<1x2x128xf32, #tpu.memory_space<vmem>>, vector<1x2x128xf32>,
    %c0_19 = arith.constant 0 : index
    %c0_20 = arith.constant 0 : index
    %c0_21 = arith.constant 0 : index
    %20 = vector.load %arg6[%c0_19, %c0_20, %c0_21] : memref<1x2x128xf32, #tpu.memory_space<vmem>>, vector<1x2x128xf32>
    %21 = vector.shape_cast %20 : vector<1x2x128xf32> to vector<2x128xf32>
    %cst_22 = arith.constant dense<0.000000e+00> : vector<2x128xf32>
    %22 = vector.multi_reduction <add>, %4, %cst_22 [1] : vector<2x8x128xf32> to vector<2x128xf32>
    %23 = arith.addf %21, %22 : vector<2x128xf32>
    %c0_23 = arith.constant 0 : index
    %c0_24 = arith.constant 0 : index
    %c0_25 = arith.constant 0 : index
    %24 = vector.load %arg6[%c0_23, %c0_24, %c0_25] : memref<1x2x128xf32, #tpu.memory_space<vmem>>, vector<1x2x128xf32>
    %25 = vector.shape_cast %24 : vector<1x2x128xf32> to vector<2x128xf32>
    %26 = vector.shape_cast %23 : vector<2x128xf32> to vector<1x2x128xf32>
    tpu.vector_store %arg6[%c0_23, %c0_24, %c0_25], %26 {strides = array<i32>} : memref<1x2x128xf32, #tpu.memory_space<vmem>>, vector<1x2x128xf32>,
    return
  }
  func.func @transform_0(%arg0: i32, %arg1: i32) -> (i32, i32, i32) {
    %c1_i32 = arith.constant 1 : i32
    %0 = arith.muli %arg0, %c1_i32 : i32
    %1 = arith.addi %0, %arg1 : i32
    %c0_i32 = arith.constant 0 : i32
    %c0_i32_0 = arith.constant 0 : i32
    %c0_i32_1 = arith.constant 0 : i32
    return %c0_i32, %1, %c0_i32_0 : i32, i32, i32
  }
  func.func @transform_1(%arg0: i32, %arg1: i32) -> (i32, i32, i32) {
    %c1_i32 = arith.constant 1 : i32
    %0 = arith.muli %arg0, %c1_i32 : i32
    %1 = arith.addi %0, %arg1 : i32
    %c0_i32 = arith.constant 0 : i32
    %c0_i32_0 = arith.constant 0 : i32
    %c0_i32_1 = arith.constant 0 : i32
    return %c0_i32, %1, %c0_i32_0 : i32, i32, i32
  }
  func.func @transform_2(%arg0: i32, %arg1: i32) -> (i32, i32, i32) {
    %c0_i32 = arith.constant 0 : i32
    %c0_i32_0 = arith.constant 0 : i32
    %c0_i32_1 = arith.constant 0 : i32
    return %arg0, %c0_i32, %c0_i32_0 : i32, i32, i32
  }
  func.func @transform_3(%arg0: i32, %arg1: i32) -> (i32, i32, i32) {
    %c0_i32 = arith.constant 0 : i32
    %c0_i32_0 = arith.constant 0 : i32
    %c0_i32_1 = arith.constant 0 : i32
    return %arg0, %c0_i32, %c0_i32_0 : i32, i32, i32
  }
  func.func @transform_4(%arg0: i32, %arg1: i32) -> (i32, i32, i32) {
    %c0_i32 = arith.constant 0 : i32
    %c0_i32_0 = arith.constant 0 : i32
    %c0_i32_1 = arith.constant 0 : i32
    return %arg0, %c0_i32, %c0_i32_0 : i32, i32, i32
  }
}

</mosaic_0001>

<bundles_post_ra>
// kernel: tpu_custom_call.1
= control target key start
LH: loop header
LB: loop body
LE: loop exit
PB: predicated region body
PF: predicated region fallthrough
CT: control target
= control target key end

     0   :  { %10 = vsyncpa [#allocation3], 0  ;;  %s366_s0 = inlined_call_operand.hbm [shape: f32[2,8,128], index: 0, kind: input, shape index: {}]   ;;  %s367_s1 = inlined_call_operand.hbm [shape: f32[2,8,128], index: 1, kind: input, shape index: {}]   ;;  %s368_s2 = inlined_call_operand.hbm [shape: f32[1,2,128], index: 2, kind: output, shape index: {0}]   ;;  %s369_s3 = inlined_call_operand.hbm [shape: f32[1,2,128], index: 3, kind: output, shape index: {1}]   ;;  %s370_s4 = inlined_call_operand.hbm [shape: f32[1,2,128], index: 4, kind: output, shape index: {2}]  }
   0x1   :  { %11 = vsyncpa [#allocation6], 0 }
   0x2   :  { %12 = vsyncpa [#allocation4], 0 }
   0x3   :  { %13 = vsyncpa [#allocation9], 0  ;;  %s21_s17 = sshll.u32 %s366_s0, 4  ;;  %s312_s18 = smov [#allocation2]   ;;  %s22_s17 = int_to_ptr.hbm [resolvable:$true] %s21_s17 }
   0x4   :  { %s23_s19 = sshll.u32 %s312_s18, 4  ;;  %s37_s22 = sshll.u32 %s367_s1, 4  ;;  %s24_s19 = int_to_ptr.vmem [resolvable:$true] %s23_s19  ;;  %s38_s22 = int_to_ptr.hbm [resolvable:$true] %s37_s22 }
   0x5   :  { %s313_s23 = smov 128   ;;  %s314_s24 = smov 8  }
   0x6   :  { %29 = dma.hbm_to_vmem [thread:$0]  %s22_s17, 256, %s24_s19, [#allocation3], %s313_s23, %s313_s23, %s314_s24  }
   0x7   :  { %s315_s25 = smov [#allocation5]  }
   0x8   :  { %s39_s26 = sshll.u32 %s315_s25, 4  ;;  %s40_s26 = int_to_ptr.vmem [resolvable:$true] %s39_s26 }
   0x9   :  { %45 = dma.hbm_to_vmem [thread:$0]  %s38_s22, 256, %s40_s26, [#allocation6], %s313_s23, %s313_s23, %s314_s24  }
   0xa   :  { %304 = dma.done.wait [#allocation3], 256  }
   0xb   :  { %305 = vsyncadd [#allocation3], 4294967040 }
   0xc   :  { %306 = dma.done.wait [#allocation6], 256  }
   0xd   :  { %307 = vsyncadd [#allocation6], 4294967040  ;;  %v316_v0 = vmov 0.0   ;;  %v63_v1 = vld [vmem:[#allocation2] sm:$0xff]  ;;  %v64_v2 = vld [vmem:[#allocation2 + $0x8] sm:$0xff]  ;;  %vm84_vm0 = vcmask 1041409  }
   0xe   :  { %61 = vst [vmem:[#allocation8] sm:$0x3] %v316_v0  ;;  %v65_v3 = vld [vmem:[#allocation5] sm:$0xff]  ;;  %v90_v4 = vrot.slane %v63_v1, 4  ;;  %v96_v5 = vrot.slane %v64_v2, 4  ;;  %v66_v6 = vld [vmem:[#allocation5 + $0x8] sm:$0xff] }
   0xf   :  { %60 = vst [vmem:[#allocation7] sm:$0x3] %v316_v0  ;;  %v68_v7 = vmul.f32 %v65_v3, %v63_v1  ;;  %v109_v8 = vrot.slane %v65_v3, 4  ;;  %v69_v9 = vmul.f32 %v66_v6, %v64_v2  ;;  %v115_v10 = vrot.slane %v66_v6, 4  ;;  %s317_s0 = smov [#allocation8]   ;;  %s145_s29 = sshll.u32 %s369_s3, 4  ;;  %s146_s29 = int_to_ptr.hbm [resolvable:$true] %s145_s29 }
  0x10   :  { %62 = vst [vmem:[#allocation10] sm:$0x3] %v316_v0  ;;  %v91_v11 = vadd.f32 %v90_v4, %v63_v1  ;;  %v97_v12 = vadd.f32 %v96_v5, %v64_v2  ;;  %s351_s1 = sshll.u32 %s317_s0, 4  ;;  %s318_s30 = smov [#allocation10]   ;;  %s144_s1 = int_to_ptr.vmem [resolvable:$true] %s351_s1 }
  0x11   :  { %v70_v13 = vrot.slane %v68_v7, 4  ;;  %v110_v14 = vadd.f32 %v109_v8, %v65_v3  ;;  %v76_v15 = vrot.slane %v69_v9, 4  ;;  %v116_v16 = vadd.f32 %v115_v10, %v66_v6  ;;  %s154_s5 = sshll.u32 %s318_s30, 4  ;;  %s156_s8 = sshll.u32 %s370_s4, 4  ;;  %s155_s5 = int_to_ptr.vmem [resolvable:$true] %s154_s5  ;;  %s157_s8 = int_to_ptr.hbm [resolvable:$true] %s156_s8 }
  0x12   :  { %v92_v17 = vrot.slane %v91_v11, 2  ;;  %v98_v18 = vrot.slane %v97_v12, 2  ;;  %s319_s9 = smov [#allocation7]   ;;  %s134_s13 = sshll.u32 %s368_s2, 4  ;;  %s135_s13 = int_to_ptr.hbm [resolvable:$true] %s134_s13 }
  0x13   :  { %v71_v19 = vadd.f32 %v70_v13, %v68_v7  ;;  %v111_v20 = vrot.slane %v110_v14, 2  ;;  %v77_v21 = vadd.f32 %v76_v15, %v69_v9  ;;  %v117_v22 = vrot.slane %v116_v16, 2  ;;  %s132_s10 = sshll.u32 %s319_s9, 4  ;;  %s133_s10 = int_to_ptr.vmem [resolvable:$true] %s132_s10 }
  0x14   :  { %v93_v23 = vadd.f32 %v92_v17, %v91_v11  ;;  %v99_v24 = vadd.f32 %v98_v18, %v97_v12 }
  0x15   :  { %v72_v25 = vrot.slane %v71_v19, 2  ;;  %v112_v26 = vadd.f32 %v111_v20, %v110_v14  ;;  %v78_v27 = vrot.slane %v77_v21, 2  ;;  %v118_v28 = vadd.f32 %v117_v22, %v116_v16  ;;  %v89_v35 = vld [vmem:[#allocation8] sm:$0x3] }
  0x16   :  { %v94_v29 = vrot.slane %v93_v23, 1  ;;  %v100_v30 = vrot.slane %v99_v24, 1  ;;  %v67_v46 = vld [vmem:[#allocation7] sm:$0x3] }
  0x17   :  { %v73_v31 = vadd.f32 %v72_v25, %v71_v19  ;;  %v113_v32 = vrot.slane %v112_v26, 1  ;;  %v79_v33 = vadd.f32 %v78_v27, %v77_v21  ;;  %v119_v34 = vrot.slane %v118_v28, 1  ;;  %v108_v41 = vld [vmem:[#allocation10] sm:$0x3] }
  0x18   :  { %v95_v36 = vadd.f32 %v94_v29, %v93_v23  ;;  %v101_v37 = vadd.f32 %v100_v30, %v99_v24 }
  0x19   :  { %v74_v38 = vrot.slane %v73_v31, 1  ;;  %v114_v39 = vadd.f32 %v113_v32, %v112_v26  ;;  %v80_v40 = vrot.slane %v79_v33, 1  ;;  %v120_v42 = vadd.f32 %v119_v34, %v118_v28 }
  0x1a   :  { %v104_v43 = vsel %vm84_vm0, %v101_v37, %v95_v36 }
  0x1b   :  { %v75_v44 = vadd.f32 %v74_v38, %v73_v31  ;;  %v106_v45 = vadd.f32 %v104_v43, %v89_v35  ;;  %v81_v47 = vadd.f32 %v80_v40, %v79_v33  ;;  %v123_v48 = vsel %vm84_vm0, %v120_v42, %v114_v39 }
  0x1c   :  { %v125_v49 = vadd.f32 %v123_v48, %v108_v41 }
  0x1d   :  { %107 = vst [vmem:[#allocation8] sm:$0x3] %v106_v45  ;;  %v85_v50 = vsel %vm84_vm0, %v81_v47, %v75_v44 }
  0x1e   :  { %v87_v51 = vadd.f32 %v85_v50, %v67_v46  ;;  %126 = vst [vmem:[#allocation10] sm:$0x3] %v125_v49  ;;  %148 = dma.vmem_to_hbm [thread:$0]  %s144_s1, 32, %s146_s29, [#allocation9]  }
  0x1f   :  { %159 = dma.vmem_to_hbm [thread:$0]  %s155_s5, 32, %s157_s8, [#allocation9]  }
  0x20   :  { %88 = vst [vmem:[#allocation7] sm:$0x3] %v87_v51 }
  0x21   :  { %137 = dma.vmem_to_hbm [thread:$0]  %s133_s10, 32, %s135_s13, [#allocation4]  }
  0x22   :  { %308 = dma.done.wait [#allocation4], 32  }
  0x23   :  { %309 = vsyncadd [#allocation4], 4294967264 }
  0x24   :  { %310 = dma.done.wait [#allocation9], 64  }
  0x25   :  { %311 = vsyncadd [#allocation9], 4294967232 }
  0x26   :  { %172 = vsyncpa [#allocation3], 1 }
  0x27   :  { %173 = vsyncpa [#allocation6], 1 }
  0x28   :  { %174 = vsyncpa [#allocation4], 1 }
  0x29   :  { %175 = vsyncpa [#allocation9], 1 }

</bundles_post_ra>
